<compile_context>
chip_gen: v6e
topology: v6e:2x2x1
jax: 0.10.0
libtpu: 0.0.40
codegen_flags: <defaults>
</compile_context>

<pallas_src>
import jax
import jax.numpy as jnp
from jax.experimental import pallas as pl
from jax.experimental.pallas import tpu as pltpu


def _round_up(x, m):
    return ((x + m - 1) // m) * m


def _linear_oneshot_kernel(x_ref, w_ref, b_ref, o_ref):
    # x_ref: (tm, K), w_ref: (tn, K), b_ref: (1, tn), o_ref: (tm, tn)
    o_ref[...] = (
        jax.lax.dot_general(
            x_ref[...],
            w_ref[...],
            dimension_numbers=(((1,), (1,)), ((), ())),
            preferred_element_type=jnp.float32,
        )
        + b_ref[...]
    ).astype(o_ref.dtype)


def _linear_ksplit_kernel(x_ref, w_ref, b_ref, o_ref, acc_ref):
    # x_ref: (tm, tk), w_ref: (tn, tk), b_ref: (1, tn), o_ref/acc_ref: (tm, tn)
    k = pl.program_id(2)

    @pl.when(k == 0)
    def _():
        acc_ref[...] = jnp.zeros_like(acc_ref)

    acc_ref[...] += jax.lax.dot_general(
        x_ref[...],
        w_ref[...],
        dimension_numbers=(((1,), (1,)), ((), ())),
        preferred_element_type=jnp.float32,
    )

    @pl.when(k == pl.num_programs(2) - 1)
    def _():
        # fp32 bias add (VPU filler under the MXU), single cast on store.
        o_ref[...] = (acc_ref[...] + b_ref[...]).astype(o_ref.dtype)


def classifier_forward(x, weight, bias, *, tm=None, tn=None, tk=None):
    """y = x @ weight.T + bias, matching torch.nn.Linear semantics.

    x:      (B, dim)
    weight: (n_way, dim)   PyTorch layout, contracted un-transposed.
    bias:   (n_way,)
    """
    B, D = x.shape
    N, Dw = weight.shape
    assert D == Dw and bias.shape == (N,)

    # Pad to TPU-friendly (sublane=8, lane=128) multiples; zero padding is
    # mathematically inert for matmul + bias.
    M_pad = _round_up(B, 8)
    K_pad = _round_up(D, 128)
    N_pad = _round_up(N, 128)   # lane-dense output -> unmasked vst

    # Lane-dense, VMEM-friendly tile defaults (well under the 32 MiB scoped
    # VMEM budget on v7x even with double-buffered inputs).
    tm = tm if tm is not None else min(256, M_pad)
    tn = tn if tn is not None else min(512, N_pad)
    tk = tk if tk is not None else min(512, K_pad)

    # Re-round padded extents so the grid divides evenly.
    M_pad = _round_up(M_pad, tm)
    K_pad = _round_up(K_pad, tk)
    N_pad = _round_up(N_pad, tn)

    x_p = x if (M_pad == B and K_pad == D) else jnp.pad(
        x, ((0, M_pad - B), (0, K_pad - D)))
    w_p = weight if (N_pad == N and K_pad == D) else jnp.pad(
        weight, ((0, N_pad - N), (0, K_pad - D)))
    b_p = (bias if N_pad == N else jnp.pad(bias, (0, N_pad - N))).reshape(1, N_pad)

    n_k = K_pad // tk
    itemsize = jnp.dtype(x.dtype).itemsize
    cost = pl.CostEstimate(
        flops=2 * M_pad * N_pad * K_pad,
        transcendentals=0,
        bytes_accessed=itemsize * (M_pad * K_pad + N_pad * K_pad
                                   + M_pad * N_pad + N_pad),
    )

    if n_k == 1:
        # Whole reduction fits in one tile: skip the accumulator scratch and
        # the reduction grid axis entirely.
        kernel = _linear_oneshot_kernel
        grid_spec = pltpu.PrefetchScalarGridSpec(
            num_scalar_prefetch=0,
            grid=(M_pad // tm, N_pad // tn),
            in_specs=[
                pl.BlockSpec((tm, K_pad), lambda i, j: (i, 0)),   # x tile
                pl.BlockSpec((tn, K_pad), lambda i, j: (j, 0)),   # weight tile (N, D)
                pl.BlockSpec((1, tn), lambda i, j: (0, j)),       # bias tile
            ],
            out_specs=pl.BlockSpec((tm, tn), lambda i, j: (i, j)),
        )
        dim_sem = ("parallel", "parallel")
    else:
        kernel = _linear_ksplit_kernel
        grid_spec = pltpu.PrefetchScalarGridSpec(
            num_scalar_prefetch=0,
            grid=(M_pad // tm, N_pad // tn, n_k),
            in_specs=[
                pl.BlockSpec((tm, tk), lambda i, j, k: (i, k)),   # x tile
                pl.BlockSpec((tn, tk), lambda i, j, k: (j, k)),   # weight tile (N, D)
                pl.BlockSpec((1, tn), lambda i, j, k: (0, j)),    # bias (N-indexed only)
            ],
            out_specs=pl.BlockSpec((tm, tn), lambda i, j, k: (i, j)),
            scratch_shapes=[pltpu.VMEM((tm, tn), jnp.float32)],
        )
        dim_sem = ("parallel", "parallel", "arbitrary")

    out_padded = pl.pallas_call(
        kernel,
        out_shape=jax.ShapeDtypeStruct((M_pad, N_pad), x.dtype),
        grid_spec=grid_spec,
        compiler_params=pltpu.CompilerParams(dimension_semantics=dim_sem),
        cost_estimate=cost,
    )(x_p, w_p, b_p)

    if M_pad == B and N_pad == N:
        return out_padded
    return out_padded[:B, :N]


if __name__ == "__main__":
    # Small shapes consistent with the module: dim=32, n_way=8, batch=8.
    B, DIM, N_WAY = 8, 32, 8

    key = jax.random.PRNGKey(0)
    kx, kw, kb = jax.random.split(key, 3)

    x = jax.random.normal(kx, (B, DIM), dtype=jnp.float32)
    # Deterministic init mimicking nn.Linear's uniform(-1/sqrt(dim), 1/sqrt(dim)).
    bound = 1.0 / jnp.sqrt(jnp.float32(DIM))
    weight = jax.random.uniform(kw, (N_WAY, DIM), minval=-bound, maxval=bound,
                                dtype=jnp.float32)
    bias = jax.random.uniform(kb, (N_WAY,), minval=-bound, maxval=bound,
                              dtype=jnp.float32)

    y = jax.jit(classifier_forward)(x, weight, bias)
    jax.block_until_ready(y)

    # Reference check against plain JAX (same math as torch Linear).
    y_ref = x @ weight.T + bias
    assert y.shape == y_ref.shape, "shape mismatch vs reference"
    assert jnp.allclose(y, y_ref, atol=1e-5, rtol=1e-5), "mismatch vs reference"

    print("KERNEL_OK")
</pallas_src>

<mosaic_0001>
module attributes {stable_mosaic.version = 11 : i64} {
  func.func @_linear_oneshot_kernel(%arg0: i32, %arg1: i32, %arg2: memref<8x128xf32, #tpu.memory_space<vmem>>, %arg3: memref<128x128xf32, #tpu.memory_space<vmem>>, %arg4: memref<1x128xf32, #tpu.memory_space<vmem>>, %arg5: memref<8x128xf32, #tpu.memory_space<vmem>>) attributes {dimension_semantics = [#tpu.dimension_semantics<parallel>, #tpu.dimension_semantics<parallel>], iteration_bounds = array<i64: 1, 1>, scalar_prefetch = 0 : i64, scratch_operands = 0 : i64, tpu.core_type = #tpu.core_type<tc>, window_params = [{transform_indices = @transform_0, window_bounds = array<i64: 8, 128>}, {transform_indices = @transform_1, window_bounds = array<i64: 128, 128>}, {transform_indices = @transform_2, window_bounds = array<i64: 1, 128>}, {transform_indices = @transform_3, window_bounds = array<i64: 8, 128>}]} {
    %c0 = arith.constant 0 : index
    %c0_0 = arith.constant 0 : index
    %0 = vector.load %arg2[%c0, %c0_0] : memref<8x128xf32, #tpu.memory_space<vmem>>, vector<8x128xf32>
    %c0_1 = arith.constant 0 : index
    %c0_2 = arith.constant 0 : index
    %1 = vector.load %arg3[%c0_1, %c0_2] : memref<128x128xf32, #tpu.memory_space<vmem>>, vector<128x128xf32>
    %cst = arith.constant dense<0.000000e+00> : vector<8x128xf32>
    %2 = tpu.matmul %0, %1, %cst {dimension_numbers = #tpu.dot_dimension_numbers<[1], [1], [0], [0], [0, 0, 1, 0], [], []>} : vector<8x128xf32>, vector<128x128xf32>, vector<8x128xf32> -> vector<8x128xf32>
    %c0_3 = arith.constant 0 : index
    %c0_4 = arith.constant 0 : index
    %3 = vector.load %arg4[%c0_3, %c0_4] : memref<1x128xf32, #tpu.memory_space<vmem>>, vector<1x128xf32>
    %4 = vector.broadcast %3 : vector<1x128xf32> to vector<8x128xf32>
    %5 = arith.addf %2, %4 : vector<8x128xf32>
    %c0_5 = arith.constant 0 : index
    %c0_6 = arith.constant 0 : index
    %6 = vector.load %arg5[%c0_5, %c0_6] : memref<8x128xf32, #tpu.memory_space<vmem>>, vector<8x128xf32>
    tpu.vector_store %arg5[%c0_5, %c0_6], %5 {strides = array<i32>} : memref<8x128xf32, #tpu.memory_space<vmem>>, vector<8x128xf32>,
    return
  }
  func.func @transform_0(%arg0: i32, %arg1: i32) -> (i32, i32) {
    %c0_i32 = arith.constant 0 : i32
    %c0_i32_0 = arith.constant 0 : i32
    return %arg0, %c0_i32 : i32, i32
  }
  func.func @transform_1(%arg0: i32, %arg1: i32) -> (i32, i32) {
    %c0_i32 = arith.constant 0 : i32
    %c0_i32_0 = arith.constant 0 : i32
    return %arg1, %c0_i32 : i32, i32
  }
  func.func @transform_2(%arg0: i32, %arg1: i32) -> (i32, i32) {
    %c0_i32 = arith.constant 0 : i32
    %c0_i32_0 = arith.constant 0 : i32
    return %c0_i32, %arg1 : i32, i32
  }
  func.func @transform_3(%arg0: i32, %arg1: i32) -> (i32, i32) {
    %c0_i32 = arith.constant 0 : i32
    return %arg0, %arg1 : i32, i32
  }
}

</mosaic_0001>

<bundles_post_ra>
// kernel: classifier_forward.1
= control target key start
LH: loop header
LB: loop body
LE: loop exit
PB: predicated region body
PF: predicated region fallthrough
CT: control target
= control target key end

     0   :  { %v202_v1 = vmov 0.0   ;;  %vm203_vm0 = vmmov 0   ;;  %s282_s0 = inlined_call_operand.vmem [shape: f32[8,128], index: 0, kind: input, shape index: {}]   ;;  %s283_s1 = inlined_call_operand.vmem [shape: f32[128,128], index: 1, kind: input, shape index: {}]   ;;  %s284_s2 = inlined_call_operand.vmem [shape: f32[1,128], index: 2, kind: input, shape index: {}]   ;;  %s285_s3 = inlined_call_operand.hbm [shape: f32[8,128], index: 3, kind: output, shape index: {}]  }
   0x1   :  { %v31_v0 = vld [vmem:[%s283_s1 + $0x78] sm:$0xff]  ;;  %142 = vmatprep.subr.mxu0 %v202_v1  ;;  %174 = vmatprep.mubr.msk.f32.mxu0 %vm203_vm0, %v202_v1  ;;  %v30_v2 = vld [vmem:[%s283_s1 + $0x70] sm:$0xff] }
   0x2   :  { %143 = vmatpush3.xpose.msra.mxu0 %v31_v0 }
   0x3   :  { %144 = vmatprep.subr.mxu0 %v202_v1 }
   0x6   :  { %145 = vmatpush3.xpose.msra.mxu0 %v30_v2 }
   0x7   :  { %8 = vsyncpa [#allocation3], 0  ;;  %146 = vmatprep.subr.mxu0 %v202_v1  ;;  %v29_v3 = vld [vmem:[%s283_s1 + $0x68] sm:$0xff]  ;;  %v28_v4 = vld [vmem:[%s283_s1 + $0x60] sm:$0xff]  ;;  %s204_s21 = smov [#allocation2]  }
   0x8   :  { %v27_v5 = vld [vmem:[%s283_s1 + $0x58] sm:$0xff]  ;;  %v26_v6 = vld [vmem:[%s283_s1 + $0x50] sm:$0xff]  ;;  %v25_v7 = vld [vmem:[%s283_s1 + $0x48] sm:$0xff]  ;;  %s116_s22 = sshll.u32 %s204_s21, 4  ;;  %s117_s22 = int_to_ptr.vmem [resolvable:$true] %s116_s22 }
   0x9   :  { %v24_v8 = vld [vmem:[%s283_s1 + $0x40] sm:$0xff]  ;;  %v23_v9 = vld [vmem:[%s283_s1 + $0x38] sm:$0xff]  ;;  %v22_v10 = vld [vmem:[%s283_s1 + $0x30] sm:$0xff]  ;;  %s180_s23 = scalar_lea.vmem %s117_s22, 128  ;;  %p185_p1 = scmp.lt.s32.totalorder %s117_s22, %s117_s22 }
   0xa   :  { %147 = vmatpush3.xpose.msra.mxu0 %v29_v3  ;;  %v21_v11 = vld [vmem:[%s283_s1 + $0x28] sm:$0xff]  ;;  %v20_v12 = vld [vmem:[%s283_s1 + $0x20] sm:$0xff]  ;;  %v19_v13 = vld [vmem:[%s283_s1 + $0x18] sm:$0xff]  ;;  %p181_p0 = scmp.ne.s32.totalorder %s117_s22, %s180_s23  ;;  %p186_p2 = scmp.lt.s32.totalorder %s180_s23, %s180_s23 }
   0xb   :  { %148 = vmatprep.subr.mxu0 %v202_v1  ;;  %v18_v14 = vld [vmem:[%s283_s1 + $0x10] sm:$0xff]  ;;  %v17_v15 = vld [vmem:[%s283_s1 + $0x8] sm:$0xff]  ;;  %v16_v16 = vld [vmem:[%s283_s1] sm:$0xff] }
   0xc   :  { %v15_v17 = vld [vmem:[%s282_s0] sm:$0xff]  ;;  %p187_p3 = por %p186_p2, %p185_p1 }
   0xd   :  { %v124_v18 = vld [vmem:[%s284_s2] ss:$0 sm:$0xff] }
   0xe   :  { %149 = vmatpush3.xpose.msra.mxu0 %v28_v4  ;;  %p188_p4 = pnand %p187_p3, %p181_p0 }
   0xf   :  { %150 = vmatprep.subr.mxu0 %v202_v1 }
  0x12   :  { %151 = vmatpush3.xpose.msra.mxu0 %v27_v5 }
  0x13   :  { %152 = vmatprep.subr.mxu0 %v202_v1 }
  0x16   :  { %153 = vmatpush3.xpose.msra.mxu0 %v26_v6 }
  0x17   :  { %154 = vmatprep.subr.mxu0 %v202_v1 }
  0x1a   :  { %155 = vmatpush3.xpose.msra.mxu0 %v25_v7 }
  0x1b   :  { %156 = vmatprep.subr.mxu0 %v202_v1 }
  0x1e   :  { %157 = vmatpush3.xpose.msra.mxu0 %v24_v8 }
  0x1f   :  { %158 = vmatprep.subr.mxu0 %v202_v1 }
  0x22   :  { %159 = vmatpush3.xpose.msra.mxu0 %v23_v9 }
  0x23   :  { %160 = vmatprep.subr.mxu0 %v202_v1 }
  0x26   :  { %161 = vmatpush3.xpose.msra.mxu0 %v22_v10 }
  0x27   :  { %162 = vmatprep.subr.mxu0 %v202_v1 }
  0x2a   :  { %163 = vmatpush3.xpose.msra.mxu0 %v21_v11 }
  0x2b   :  { %164 = vmatprep.subr.mxu0 %v202_v1 }
  0x2e   :  { %165 = vmatpush3.xpose.msra.mxu0 %v20_v12 }
  0x2f   :  { %166 = vmatprep.subr.mxu0 %v202_v1 }
  0x32   :  { %167 = vmatpush3.xpose.msra.mxu0 %v19_v13 }
  0x33   :  { %168 = vmatprep.subr.mxu0 %v202_v1 }
  0x36   :  { %169 = vmatpush3.xpose.msra.mxu0 %v18_v14 }
  0x37   :  { %170 = vmatprep.subr.mxu0 %v202_v1 }
  0x3a   :  { %171 = vmatpush3.xpose.msra.mxu0 %v17_v15 }
  0x3b   :  { %172 = vmatprep.subr.mxu0 %v202_v1 }
  0x3e   :  { %173 = vmatpush3.xpose.msra.mxu0 %v16_v16 }
  0x41   :  { %175 = vmatmul.mubr.f32.vlgmr.msra.gmra.mxu0 %v15_v17 }
 0x101   :  { %v105_v19 = vpop.f32.mrf.mxu0 }
 0x102   :  { %v106_v20 = vadd.f32 %v124_v18, %v105_v19 }
 0x103   :  { %v176_v21 = vpop.f32.mrf.mxu0 }
 0x104   :  { %109 = vst [vmem:[#allocation2] sm:$0xff] %v106_v20 }
 0x105   :  { %191 = shalt.err (!%p188_p4)
}
 0x106   :  { %119 = dma.vmem_to_hbm [thread:$0]  %s117_s22, 128, %s285_s3, [#allocation3]  }
 0x107   :  { %200 = dma.done.wait [#allocation3], 128  }
 0x108   :  { %201 = vsyncadd [#allocation3], 4294967168 }
 0x109   :  { %123 = vsyncpa [#allocation3], 1 }

</bundles_post_ra>
